<compile_context>
chip_gen: v7x
topology: tpu7x:2x2x1
jax: 0.10.0
libtpu: 0.0.40
codegen_flags: <defaults>
</compile_context>

<pallas_src>
import math

import jax
import jax.numpy as jnp
from jax.experimental import pallas as pl
from jax.experimental.pallas import tpu as pltpu


def _attention_pooling_kernel(x_ref, wp_ref, bp_ref, wa_ref, ba_ref,
                              wo_ref, bo_ref, mask_ref, o_ref):
    TB, S, C = x_ref.shape
    H = wp_ref.shape[1]

    # ---- proj: one MXU matmul over all TB*S rows, f32 accumulation ----------
    x2 = x_ref[...].reshape(TB * S, C)
    xp = jnp.dot(x2, wp_ref[...], preferred_element_type=jnp.float32)
    xp = xp + bp_ref[...]                                # (TB*S, H) f32
    xp3 = xp.reshape(TB, S, H)                           # (TB, S, H)

    # ---- attention scores: VPU multiply + lane reduce (no N=1 MXU pass) -----
    # wa_ref / ba_ref are already pre-scaled by 1/sqrt(H) on the host.
    scores = jnp.sum(xp3 * wa_ref[...], axis=-1)         # (TB, S), S on lanes
    scores = scores + ba_ref[...] + mask_ref[...]        # bias + additive mask

    # ---- lane-dense softmax over the sequence axis ---------------------------
    s_max = jnp.max(scores, axis=-1, keepdims=True)      # (TB, 1)
    e = jnp.exp(scores - s_max)
    w = e / jnp.sum(e, axis=-1, keepdims=True)           # (TB, S) f32

    # ---- pooling as a batched MXU matmul: (TB,1,S) @ (TB,S,H) -> (TB,1,H) ----
    pooled = jnp.einsum('bqs,bsh->bqh', w[:, None, :], xp3,
                        preferred_element_type=jnp.float32).reshape(TB, H)

    # ---- out_proj ------------------------------------------------------------
    out = jnp.dot(pooled.astype(wo_ref.dtype), wo_ref[...],
                  preferred_element_type=jnp.float32)
    out = out + bo_ref[...]                              # (TB, H)
    o_ref[...] = out.astype(o_ref.dtype)


def _choose_tb(B, S, C, H, elem_bytes, *, target_rows=256,
               vmem_budget=48 * 2 ** 20):
    """Pick the batch tile TB: aim for TB*S ~ target_rows, cap by VMEM budget."""
    tb = max(1, target_rows // max(S, 1))
    if tb >= B:
        return B                       # whole batch in one step (full-extent blocks)
    tb = max(8, (tb // 8) * 8)         # sublane-aligned for (TB, S)/(TB, H) blocks

    # keep >= 2 grid steps so both v7x TensorCores get work
    while tb > 8 and -(-B // tb) < 2:
        tb = max(8, (tb // 2) // 8 * 8)

    def footprint(t):
        io = 2 * (t * S * C * elem_bytes + t * S * 4 + t * H * 4)   # double-buffered
        wts = 2 * ((C * H + H * H) * elem_bytes + (3 * H + 2) * 4)
        inter = 6 * t * S * H * 4                                   # f32 temporaries
        return io + wts + inter

    while tb > 8 and footprint(tb) > vmem_budget:
        tb = max(8, (tb // 2) // 8 * 8)
    return tb


def attention_pooling(x, params, attention_mask=None, *,
                      matmul_dtype=jnp.bfloat16):
    """x: [B, S, C_cat]; attention_mask: [B, S] (1 = keep) or None."""
    B, S, C = x.shape
    wp, bp, wa, ba, wo, bo = params
    H = wp.shape[0]
    inv_scale = 1.0 / math.sqrt(H)

    x = x.astype(jnp.float32)

    # additive mask with exact PyTorch semantics: (1 - mask) * finfo(f32).min
    if attention_mask is None:
        addmask = jnp.zeros((B, S), jnp.float32)
    else:
        addmask = (1.0 - attention_mask.astype(jnp.float32)) * \
            jnp.finfo(jnp.float32).min

    # weights pre-transposed to [in, out]; 1/sqrt(H) folded into attention w & b
    wp_t = wp.T.astype(matmul_dtype)                                  # (C, H)
    bp2 = bp.reshape(1, H).astype(jnp.float32)
    wa_row = (wa.reshape(1, H) * inv_scale).astype(jnp.float32)       # (1, H)
    ba2 = (ba.reshape(1, 1) * inv_scale).astype(jnp.float32)          # (1, 1)
    wo_t = wo.T.astype(matmul_dtype)                                  # (H, H)
    bo2 = bo.reshape(1, H).astype(jnp.float32)

    x_in = x.astype(matmul_dtype)

    elem = jnp.dtype(matmul_dtype).itemsize
    TB = _choose_tb(B, S, C, H, elem)
    Bp = -(-B // TB) * TB
    if Bp != B:
        # zero-padded rows get an all-zero additive mask -> finite uniform
        # softmax, and their outputs are sliced off below.
        x_in = jnp.pad(x_in, ((0, Bp - B), (0, 0), (0, 0)))
        addmask = jnp.pad(addmask, ((0, Bp - B), (0, 0)))

    est = (2 * (TB * S * C * elem + TB * S * 4 + TB * H * 4)
           + 2 * ((C * H + H * H) * elem + (3 * H + 2) * 4)
           + 6 * TB * S * H * 4)
    vmem_limit = int(min(48 * 2 ** 20, max(8 * 2 ** 20, 2 * est)))

    out = pl.pallas_call(
        _attention_pooling_kernel,
        out_shape=jax.ShapeDtypeStruct((Bp, H), jnp.float32),
        grid_spec=pltpu.PrefetchScalarGridSpec(
            num_scalar_prefetch=0,
            grid=(Bp // TB,),
            in_specs=[
                pl.BlockSpec((TB, S, C), lambda b: (b, 0, 0)),   # x
                pl.BlockSpec((C, H), lambda b: (0, 0)),          # proj weight^T
                pl.BlockSpec((1, H), lambda b: (0, 0)),          # proj bias
                pl.BlockSpec((1, H), lambda b: (0, 0)),          # attn weight row (scaled)
                pl.BlockSpec((1, 1), lambda b: (0, 0)),          # attn bias (scaled)
                pl.BlockSpec((H, H), lambda b: (0, 0)),          # out_proj weight^T
                pl.BlockSpec((1, H), lambda b: (0, 0)),          # out_proj bias
                pl.BlockSpec((TB, S), lambda b: (b, 0)),         # additive mask
            ],
            out_specs=pl.BlockSpec((TB, H), lambda b: (b, 0)),
        ),
        compiler_params=pltpu.CompilerParams(
            dimension_semantics=("parallel",),
            vmem_limit_bytes=vmem_limit),
    )(x_in, wp_t, bp2, wa_row, ba2, wo_t, bo2, addmask)

    return out[:B]


def _reference(x, params, attention_mask=None):
    wp, bp, wa, ba, wo, bo = params
    H = wp.shape[0]
    xp = x @ wp.T + bp
    scores = (xp @ wa.T + ba) / math.sqrt(H)
    if attention_mask is not None:
        neg = (1.0 - attention_mask[:, :, None].astype(jnp.float32)) \
            * jnp.finfo(jnp.float32).min
        scores = scores + neg
    w = jax.nn.softmax(scores, axis=1)
    pooled = jnp.sum(w * xp, axis=1)
    return pooled @ wo.T + bo


def _init_params(key, concatenated_size, input_size):
    ks = jax.random.split(key, 6)

    def linear(kw, kb, fan_in, fan_out):
        bound = 1.0 / math.sqrt(fan_in)
        w = jax.random.uniform(kw, (fan_out, fan_in), jnp.float32, -bound, bound)
        b = jax.random.uniform(kb, (fan_out,), jnp.float32, -bound, bound)
        return w, b

    wp, bp = linear(ks[0], ks[1], concatenated_size, input_size)   # proj
    wa, ba = linear(ks[2], ks[3], input_size, 1)                   # attention
    wo, bo = linear(ks[4], ks[5], input_size, input_size)          # out_proj
    return (wp, bp, wa, ba, wo, bo)


if __name__ == "__main__":
    B, S = 2, 8
    concatenated_size, input_size = 64, 32

    key = jax.random.PRNGKey(0)
    k_x, k_m, k_p = jax.random.split(key, 3)

    x = jax.random.normal(k_x, (B, S, concatenated_size), dtype=jnp.float32)
    # deterministic 0/1 mask (first element of each row always kept)
    mask = (jax.random.uniform(k_m, (B, S)) > 0.3).astype(jnp.float32)
    mask = mask.at[:, 0].set(1.0)

    params = _init_params(k_p, concatenated_size, input_size)
    ref = _reference(x, params, attention_mask=mask)

    # f32 matmul path: tight check against the reference
    out_f32 = attention_pooling(x, params, attention_mask=mask,
                                matmul_dtype=jnp.float32)
    out_f32 = jax.block_until_ready(out_f32)
    assert out_f32.shape == (B, input_size)
    assert jnp.allclose(out_f32, ref, atol=1e-4, rtol=1e-4), "f32 mismatch vs reference"

    # bf16 matmul-input path (f32 accumulation / softmax): looser check
    out_bf16 = attention_pooling(x, params, attention_mask=mask)
    out_bf16 = jax.block_until_ready(out_bf16)
    assert out_bf16.shape == (B, input_size)
    assert jnp.allclose(out_bf16, ref, atol=5e-2, rtol=5e-2), "bf16 mismatch vs reference"

    # no-mask path
    out_nm = attention_pooling(x, params, matmul_dtype=jnp.float32)
    out_nm = jax.block_until_ready(out_nm)
    ref_nm = _reference(x, params, None)
    assert jnp.allclose(out_nm, ref_nm, atol=1e-4, rtol=1e-4), "no-mask mismatch"

    print("KERNEL_OK")
</pallas_src>

<mosaic_0001>
module attributes {stable_mosaic.version = 11 : i64} {
  func.func @_attention_pooling_kernel(%arg0: i32, %arg1: memref<2x8x64xf32, #tpu.memory_space<vmem>>, %arg2: memref<64x32xf32, #tpu.memory_space<vmem>>, %arg3: memref<1x32xf32, #tpu.memory_space<vmem>>, %arg4: memref<1x32xf32, #tpu.memory_space<vmem>>, %arg5: memref<1x1xf32, #tpu.memory_space<vmem>>, %arg6: memref<32x32xf32, #tpu.memory_space<vmem>>, %arg7: memref<1x32xf32, #tpu.memory_space<vmem>>, %arg8: memref<2x8xf32, #tpu.memory_space<vmem>>, %arg9: memref<2x32xf32, #tpu.memory_space<vmem>>) attributes {dimension_semantics = [#tpu.dimension_semantics<parallel>], iteration_bounds = array<i64: 1>, scalar_prefetch = 0 : i64, scratch_operands = 0 : i64, tpu.core_type = #tpu.core_type<tc>, window_params = [{transform_indices = @transform_0, window_bounds = array<i64: 2, 8, 64>}, {pipeline_mode = #tpu.pipeline_mode<synchronous>, transform_indices = @transform_1, window_bounds = array<i64: 64, 32>}, {pipeline_mode = #tpu.pipeline_mode<synchronous>, transform_indices = @transform_2, window_bounds = array<i64: 1, 32>}, {pipeline_mode = #tpu.pipeline_mode<synchronous>, transform_indices = @transform_3, window_bounds = array<i64: 1, 32>}, {pipeline_mode = #tpu.pipeline_mode<synchronous>, transform_indices = @transform_4, window_bounds = array<i64: 1, 1>}, {pipeline_mode = #tpu.pipeline_mode<synchronous>, transform_indices = @transform_5, window_bounds = array<i64: 32, 32>}, {pipeline_mode = #tpu.pipeline_mode<synchronous>, transform_indices = @transform_6, window_bounds = array<i64: 1, 32>}, {transform_indices = @transform_7, window_bounds = array<i64: 2, 8>}, {transform_indices = @transform_8, window_bounds = array<i64: 2, 32>}]} {
    %c0 = arith.constant 0 : index
    %c0_0 = arith.constant 0 : index
    %c0_1 = arith.constant 0 : index
    %0 = vector.load %arg1[%c0, %c0_0, %c0_1] : memref<2x8x64xf32, #tpu.memory_space<vmem>>, vector<2x8x64xf32>
    %1 = vector.shape_cast %0 : vector<2x8x64xf32> to vector<16x64xf32>
    %c0_2 = arith.constant 0 : index
    %c0_3 = arith.constant 0 : index
    %2 = vector.load %arg2[%c0_2, %c0_3] : memref<64x32xf32, #tpu.memory_space<vmem>>, vector<64x32xf32>
    %cst = arith.constant dense<0.000000e+00> : vector<16x32xf32>
    %3 = tpu.matmul %1, %2, %cst {dimension_numbers = #tpu.dot_dimension_numbers<[1], [0], [0], [1], [0, 0, 1, 1], [], []>} : vector<16x64xf32>, vector<64x32xf32>, vector<16x32xf32> -> vector<16x32xf32>
    %c0_4 = arith.constant 0 : index
    %c0_5 = arith.constant 0 : index
    %4 = vector.load %arg3[%c0_4, %c0_5] : memref<1x32xf32, #tpu.memory_space<vmem>>, vector<1x32xf32>
    %5 = vector.broadcast %4 : vector<1x32xf32> to vector<16x32xf32>
    %6 = arith.addf %3, %5 : vector<16x32xf32>
    %7 = vector.shape_cast %6 : vector<16x32xf32> to vector<2x8x32xf32>
    %c0_6 = arith.constant 0 : index
    %c0_7 = arith.constant 0 : index
    %8 = vector.load %arg4[%c0_6, %c0_7] : memref<1x32xf32, #tpu.memory_space<vmem>>, vector<1x32xf32>
    %9 = vector.shape_cast %8 : vector<1x32xf32> to vector<1x1x32xf32>
    %10 = vector.broadcast %9 : vector<1x1x32xf32> to vector<2x8x32xf32>
    %11 = arith.mulf %7, %10 : vector<2x8x32xf32>
    %cst_8 = arith.constant dense<0.000000e+00> : vector<2x8xf32>
    %12 = vector.multi_reduction <add>, %11, %cst_8 [2] : vector<2x8x32xf32> to vector<2x8xf32>
    %c0_9 = arith.constant 0 : index
    %c0_10 = arith.constant 0 : index
    %13 = vector.load %arg5[%c0_9, %c0_10] : memref<1x1xf32, #tpu.memory_space<vmem>>, vector<1x1xf32>
    %14 = vector.broadcast %13 : vector<1x1xf32> to vector<2x8xf32>
    %15 = arith.addf %12, %14 : vector<2x8xf32>
    %c0_11 = arith.constant 0 : index
    %c0_12 = arith.constant 0 : index
    %16 = vector.load %arg8[%c0_11, %c0_12] : memref<2x8xf32, #tpu.memory_space<vmem>>, vector<2x8xf32>
    %17 = arith.addf %15, %16 : vector<2x8xf32>
    %cst_13 = arith.constant dense<0xFF800000> : vector<2xf32>
    %18 = vector.multi_reduction <maximumf>, %17, %cst_13 [1] : vector<2x8xf32> to vector<2xf32>
    %19 = vector.shape_cast %18 : vector<2xf32> to vector<2x1xf32>
    %20 = vector.broadcast %19 : vector<2x1xf32> to vector<2x8xf32>
    %21 = arith.subf %17, %20 : vector<2x8xf32>
    %22 = math.exp %21 : vector<2x8xf32>
    %cst_14 = arith.constant dense<0.000000e+00> : vector<2xf32>
    %23 = vector.multi_reduction <add>, %22, %cst_14 [1] : vector<2x8xf32> to vector<2xf32>
    %24 = vector.shape_cast %23 : vector<2xf32> to vector<2x1xf32>
    %25 = vector.broadcast %24 : vector<2x1xf32> to vector<2x8xf32>
    %26 = arith.divf %22, %25 : vector<2x8xf32>
    %27 = vector.shape_cast %26 : vector<2x8xf32> to vector<2x1x8xf32>
    "tpu.trace_start"() <{level = 10 : i32, message = "bqs,bsh->bqh"}> : () -> ()
    %cst_15 = arith.constant dense<0.000000e+00> : vector<2x1x32xf32>
    %28 = tpu.matmul %27, %7, %cst_15 {dimension_numbers = #tpu.dot_dimension_numbers<[2], [1], [1], [2], [0, 0, 0, 1, 1, 2], [0], [0]>} : vector<2x1x8xf32>, vector<2x8x32xf32>, vector<2x1x32xf32> -> vector<2x1x32xf32>
    "tpu.trace_stop"() : () -> ()
    %29 = vector.shape_cast %28 : vector<2x1x32xf32> to vector<2x32xf32>
    %c0_16 = arith.constant 0 : index
    %c0_17 = arith.constant 0 : index
    %30 = vector.load %arg6[%c0_16, %c0_17] : memref<32x32xf32, #tpu.memory_space<vmem>>, vector<32x32xf32>
    %cst_18 = arith.constant dense<0.000000e+00> : vector<2x32xf32>
    %31 = tpu.matmul %29, %30, %cst_18 {dimension_numbers = #tpu.dot_dimension_numbers<[1], [0], [0], [1], [0, 0, 1, 1], [], []>} : vector<2x32xf32>, vector<32x32xf32>, vector<2x32xf32> -> vector<2x32xf32>
    %c0_19 = arith.constant 0 : index
    %c0_20 = arith.constant 0 : index
    %32 = vector.load %arg7[%c0_19, %c0_20] : memref<1x32xf32, #tpu.memory_space<vmem>>, vector<1x32xf32>
    %33 = vector.broadcast %32 : vector<1x32xf32> to vector<2x32xf32>
    %34 = arith.addf %31, %33 : vector<2x32xf32>
    %c0_21 = arith.constant 0 : index
    %c0_22 = arith.constant 0 : index
    %35 = vector.load %arg9[%c0_21, %c0_22] : memref<2x32xf32, #tpu.memory_space<vmem>>, vector<2x32xf32>
    tpu.vector_store %arg9[%c0_21, %c0_22], %34 {strides = array<i32>} : memref<2x32xf32, #tpu.memory_space<vmem>>, vector<2x32xf32>,
    return
  }
  func.func @transform_0(%arg0: i32) -> (i32, i32, i32) {
    %c0_i32 = arith.constant 0 : i32
    %c0_i32_0 = arith.constant 0 : i32
    %c0_i32_1 = arith.constant 0 : i32
    return %arg0, %c0_i32, %c0_i32_0 : i32, i32, i32
  }
  func.func @transform_1(%arg0: i32) -> (i32, i32) {
    %c0_i32 = arith.constant 0 : i32
    %c0_i32_0 = arith.constant 0 : i32
    %c0_i32_1 = arith.constant 0 : i32
    return %c0_i32, %c0_i32_0 : i32, i32
  }
  func.func @transform_2(%arg0: i32) -> (i32, i32) {
    %c0_i32 = arith.constant 0 : i32
    %c0_i32_0 = arith.constant 0 : i32
    %c0_i32_1 = arith.constant 0 : i32
    return %c0_i32, %c0_i32_0 : i32, i32
  }
  func.func @transform_3(%arg0: i32) -> (i32, i32) {
    %c0_i32 = arith.constant 0 : i32
    %c0_i32_0 = arith.constant 0 : i32
    %c0_i32_1 = arith.constant 0 : i32
    return %c0_i32, %c0_i32_0 : i32, i32
  }
  func.func @transform_4(%arg0: i32) -> (i32, i32) {
    %c0_i32 = arith.constant 0 : i32
    %c0_i32_0 = arith.constant 0 : i32
    %c0_i32_1 = arith.constant 0 : i32
    return %c0_i32, %c0_i32_0 : i32, i32
  }
  func.func @transform_5(%arg0: i32) -> (i32, i32) {
    %c0_i32 = arith.constant 0 : i32
    %c0_i32_0 = arith.constant 0 : i32
    %c0_i32_1 = arith.constant 0 : i32
    return %c0_i32, %c0_i32_0 : i32, i32
  }
  func.func @transform_6(%arg0: i32) -> (i32, i32) {
    %c0_i32 = arith.constant 0 : i32
    %c0_i32_0 = arith.constant 0 : i32
    %c0_i32_1 = arith.constant 0 : i32
    return %c0_i32, %c0_i32_0 : i32, i32
  }
  func.func @transform_7(%arg0: i32) -> (i32, i32) {
    %c0_i32 = arith.constant 0 : i32
    %c0_i32_0 = arith.constant 0 : i32
    return %arg0, %c0_i32 : i32, i32
  }
  func.func @transform_8(%arg0: i32) -> (i32, i32) {
    %c0_i32 = arith.constant 0 : i32
    %c0_i32_0 = arith.constant 0 : i32
    return %arg0, %c0_i32 : i32, i32
  }
}

</mosaic_0001>

<bundles_post_ra>
// kernel: tpu_custom_call.1
= control target key start
LH: loop header
LB: loop body
LE: loop exit
PB: predicated region body
PF: predicated region fallthrough
CT: control target
= control target key end

     0   :  { %s801_s0 = inlined_call_operand.vmem [shape: f32[2,8,64], index: 0, kind: input, shape index: {}]   ;;  %s802_s1 = inlined_call_operand.vmem [shape: f32[64,32], index: 1, kind: input, shape index: {}]   ;;  %s803_s2 = inlined_call_operand.vmem [shape: f32[1,32], index: 2, kind: input, shape index: {}]   ;;  %s804_s3 = inlined_call_operand.vmem [shape: f32[1,32], index: 3, kind: input, shape index: {}]   ;;  %s805_s4 = inlined_call_operand.<no memory space> [shape: f32[1,1], index: 4, kind: input, shape index: {}]   ;;  %s806_s5 = inlined_call_operand.vmem [shape: f32[32,32], index: 5, kind: input, shape index: {}]   ;;  %s807_s6 = inlined_call_operand.vmem [shape: f32[1,32], index: 6, kind: input, shape index: {}]   ;;  %s808_s7 = inlined_call_operand.vmem [shape: f32[2,8], index: 7, kind: input, shape index: {}]   ;;  %s809_s8 = inlined_call_operand.hbm [shape: f32[2,32], index: 8, kind: output, shape index: {}]  }
   0x1   :  { %v13_v0 = vstv %s805_s4 }
   0x2   :  { %14 = vst [vmem:[#allocation2] sm:$0x1] %v13_v0 }
   0x3   :  { %v34_v1 = vld [vmem:[%s802_s1] sm:$0xff]  ;;  %v35_v2 = vld [vmem:[%s802_s1 + $0x8] sm:$0xff]  ;;  %v36_v3 = vld [vmem:[%s802_s1 + $0x10] sm:$0xff]  ;;  %vm49_vm0 = vcmask 523264  }
   0x4   :  { %v589_v4 = vpack.c.bf16 %v35_v2, %v34_v1  ;;  %v37_v5 = vld [vmem:[%s802_s1 + $0x18] sm:$0xff]  ;;  %v38_v7 = vld [vmem:[%s802_s1 + $0x20] sm:$0xff]  ;;  %v39_v8 = vld [vmem:[%s802_s1 + $0x28] sm:$0xff] }
   0x5   :  { %v593_v6 = vpack.c.bf16 %v37_v5, %v36_v3  ;;  %v32_v9 = vld [vmem:[%s801_s0] sm:$0xff] }
   0x6   :  { %590 = vmatprep.subr.bf16.mxu0 %v589_v4  ;;  %565 = vmatprep.mubr.msk.f32.mxu0 %vm49_vm0, %v32_v9 }
   0x7   :  { %15 = vsyncpa [#allocation4], 0  ;;  %592 = vmatpush3.bf16.msra.mxu0 %v589_v4  ;;  %v597_v10 = vpack.c.bf16 %v39_v8, %v38_v7  ;;  %v40_v11 = vld [vmem:[%s802_s1 + $0x30] sm:$0xff]  ;;  %v41_v12 = vld [vmem:[%s802_s1 + $0x38] sm:$0xff]  ;;  %v650_v15 = vmov 0.0   ;;  %v161_v17 = vlaneseq  ;;  %v651_v18 = vmov 0  }
   0x8   :  { %594 = vmatprep.subr.bf16.mxu0 %v593_v6  ;;  %v601_v13 = vpack.c.bf16 %v41_v12, %v40_v11  ;;  %v33_v14 = vld [vmem:[%s801_s0 + $0x8] sm:$0xff]  ;;  %568 = vmatprep.subr.mxu1 %v650_v15  ;;  %v159_v21 = vld [vmem:[%s808_s7] sm:$0x3]  ;;  %vm140_vm1 = vcmask 261120   ;;  %vm197_vm2 = vcmask 1041409   ;;  %vm200_vm3 = vcmask 58368  }
   0x9   :  { %v525_v16 = vld [vmem:[#allocation2] ss:$0 sm:$0xff]  ;;  %616 = vset.pattern.permute.xlu1 %v651_v18  ;;  %617 = vset.pattern.permute.xlu0 %v651_v18  ;;  %v162_v19 = vshrl.u32 %v161_v17, 7  ;;  %v188_v20 = vand.u32 127, %v161_v17  ;;  %vm652_vm4 = vmmov 0   ;;  %vm265_vm5 = vcmask 64512  }
   0xa   :  { %154 = vperm.xlu1 %616, %v525_v16   ;;  %v521_v25 = vld [vmem:[%s803_s2] ss:$0 sm:$0xff]  ;;  %570 = vmatprep.mubr.msk.f32.mxu1 %vm652_vm4, %v650_v15  ;;  %v419_v16 = vld [vmem:[%s806_s5 + $0x8] sm:$0xff]  ;;  %v653_v18 = vmov 0.0|0.0   ;;  %s654_s4 = smov [#allocation3]   ;;  %vm505_vm6 = vcmask 254976  }
   0xb   :  { %596 = vmatpush3.bf16.msra.mxu0 %v593_v6  ;;  %v739_v22 = vsub.s32 0, %v162_v19  ;;  %v741_v23 = vsub.s32 %v188_v20, %v162_v19  ;;  %v524_v27 = vld [vmem:[%s804_s3] ss:$0 sm:$0xff]  ;;  %v170_v35 = vsub.s32 1, %v162_v19  ;;  %v420_v19 = vld [vmem:[%s806_s5 + $0x10] sm:$0xff]  ;;  %s513_s15 = sshll.u32 %s654_s4, 4  ;;  %s514_s15 = int_to_ptr.vmem [resolvable:$true] %s513_s15 }
   0xc   :  { %598 = vmatprep.subr.bf16.mxu0 %v597_v10  ;;  %p631_p1 = scmp.lt.s32.totalorder %s514_s15, %s514_s15 }
   0xd   :  { %v164_v24 = vrot.slane %v159_v21, %v739_v22  ;;  %v171_v36 = vrot.slane %v159_v21, %v170_v35 }
   0xf   :  { %600 = vmatpush3.bf16.msra.mxu0 %v597_v10  ;;  %166 = vbcast.lane.b32.xlu1 %v164_v24, 256 }
  0x10   :  { %602 = vmatprep.subr.bf16.mxu0 %v601_v13 }
  0x13   :  { %604 = vmatpush3.bf16.msra.mxu0 %v601_v13 }
  0x16   :  { %566 = vmatmul.mubr.msk.f32.vlgmr.msra.gmra.mrb[0].mxu0 %vm49_vm0, %v33_v14  ;;  %v418_v14 = vld [vmem:[%s806_s5] sm:$0xff] }
  0x17   :  { %v606_v17 = vpack.c.bf16 %v419_v16, %v418_v14 }
  0x89   :  { %v155_v37 = vpop.permute.xlu1 %154 }
  0x8d   :  { %v167_v40 = vpop.permute.xlu1 %166 }
  0xe9   :  { %v567_v26 = vpop.f32.mrb[0].mxu0 }
  0xea   :  { %v750_v28 = vadd.f32 %v567_v26, %v521_v25  ;;  %v122_v29 = vpop.f32.mrb[1].mxu0 }
  0xeb   :  { %v123_v30 = vadd.f32 %v521_v25, %v122_v29 }
  0xec   :  { %v139_v31 = vmul.f32 %v524_v27, %v750_v28 }
  0xed   :  { %569 = vmatpush3.msra.mxu1 %v123_v30  ;;  %v138_v33 = vmul.f32 %v524_v27, %v123_v30  ;;  %v528_v27 = vld [vmem:[%s807_s6] ss:$0 sm:$0xff] }
  0xee   :  { %v144_v32 = vsel %vm140_vm1, %v139_v31, 0.0  ;;  %573 = vmatprep.subr.mxu1 %v650_v15 }
  0xef   :  { %145 = vadd.xlane.f32.xlu0 %v144_v32  ;;  %v141_v34 = vsel %vm140_vm1, %v138_v33, 0.0 }
  0xf3   :  { %142 = vadd.xlane.f32.xlu0 %v141_v34 }
 0x109   :  { %173 = vbcast.lane.b32.xlu0 %v171_v36, 256 }
 0x17c   :  { %v146_v38 = vpop.xlane.xlu0 %145 }
 0x17d   :  { %v158_v44 = vadd.f32 %v155_v37, %v146_v38 }
 0x180   :  { %v143_v39 = vpop.xlane.xlu0 %142 }
 0x181   :  { %v157_v41 = vadd.f32 %v155_v37, %v143_v39 }
 0x183   :  { %v177_v42 = vadd.f32 %v167_v40, %v157_v41 }
 0x184   :  { %v174_v43 = vpop.permute.xlu0 %173 }
 0x185   :  { %182 = vperm.xlu1 %616, %v177_v42   ;;  %v178_v45 = vadd.f32 %v174_v43, %v158_v44 }
 0x189   :  { %185 = vperm.xlu1 %616, %v178_v45  }
 0x204   :  { %v183_v46 = vpop.permute.xlu1 %182 }
 0x205   :  { %v192_v48 = vrot.slane %v183_v46, %v741_v23 }
 0x208   :  { %v186_v47 = vpop.permute.xlu1 %185 }
 0x209   :  { %v196_v49 = vrot.slane %v186_v47, %v741_v23 }
 0x20b   :  { %v198_v50 = vsel %vm197_vm2, %v196_v49, %v192_v48 }
 0x20c   :  { %v201_v51 = vsel %vm200_vm3, %v198_v50, -inf }
 0x20d   :  { %202 = vmax.xlane.f32.xlu1 %v201_v51 }
 0x29a   :  { %v203_v52 = vpop.xlane.xlu1 %202 }
 0x29b   :  { %v208_v53 = vrot.slane %v203_v52, %v739_v22  ;;  %v212_v54 = vrot.slane %v203_v52, %v170_v35 }
 0x29d   :  { %v215_v55 = vsub.f32 %v177_v42, %v208_v53  ;;  %v216_v56 = vsub.f32 %v178_v45, %v212_v54 }
 0x29f   :  { %v217_v57 = vmul.f32 1.442695, %v215_v55  ;;  %v219_v58 = vmul.f32 1.442695, %v216_v56 }
 0x2a1   :  { %618 = vpow2.f32 %v217_v57 }
 0x2a2   :  { %620 = vpow2.f32 %v219_v58 }
 0x2ab   :  { %v619_v59 = vpop.eup %618 }
 0x2ac   :  { %224 = vperm.xlu0 %617, %v619_v59   ;;  %v621_v60 = vpop.eup %620 }
 0x2b0   :  { %227 = vperm.xlu0 %617, %v621_v60  }
 0x32b   :  { %v225_v61 = vpop.permute.xlu0 %224 }
 0x32c   :  { %v232_v63 = vrot.slane %v225_v61, %v741_v23 }
 0x32f   :  { %v228_v62 = vpop.permute.xlu0 %227 }
 0x330   :  { %v236_v0 = vrot.slane %v228_v62, %v741_v23 }
 0x332   :  { %v237_v1 = vsel %vm197_vm2, %v236_v0, %v232_v63 }
 0x333   :  { %v239_v2 = vsel %vm200_vm3, %v237_v1, 0.0 }
 0x334   :  { %240 = vadd.xlane.f32.xlu0 %v239_v2 }
 0x3c1   :  { %v241_v3 = vpop.xlane.xlu0 %240 }
 0x3c2   :  { %v246_v4 = vrot.slane %v241_v3, %v739_v22  ;;  %v250_v5 = vrot.slane %v241_v3, %v170_v35 }
 0x3c4   :  { %622 = vrcp.f32 %v246_v4 }
 0x3c5   :  { %624 = vrcp.f32 %v250_v5 }
 0x3ce   :  { %v623_v6 = vpop.eup %622 }
 0x3cf   :  { %v254_v7 = vmul.f32 %v623_v6, %v619_v59  ;;  %v625_v8 = vpop.eup %624 }
 0x3d0   :  { %v256_v9 = vmul.f32 %v625_v8, %v621_v60 }
 0x3d1   :  { %259 = vperm.xlu1 %616, %v254_v7  }
 0x3d5   :  { %340 = vperm.xlu1 %616, %v256_v9  }
 0x450   :  { %v260_v10 = vpop.permute.xlu1 %259 }
 0x451   :  { %v264_v11 = vrot.slane %v260_v10, %v741_v23 }
 0x453   :  { %571 = vmatmul.mubr.msk.f32.vlgmr.msra.gmra.mrb[0].mxu1 %vm265_vm5, %v264_v11 }
 0x454   :  { %574 = vmatpush3.msra.mxu1 %v750_v28  ;;  %v341_v12 = vpop.permute.xlu1 %340  ;;  %575 = vmatprep.mubr.msk.f32.mxu1 %vm652_vm4, %v650_v15 }
 0x455   :  { %v345_v13 = vrot.slane %v341_v12, %v741_v23  ;;  %605 = vmatprep.subr.bf16.mxu1 %v653_v18 }
 0x457   :  { %576 = vmatmul.mubr.msk.f32.vlgmr.msra.gmra.mrb[2].mxu1 %vm265_vm5, %v345_v13 }
 0x458   :  { %586 = vmatprep.mubr.msk.f32.mxu1 %vm652_vm4, %v650_v15  ;;  %607 = vmatpush3.bf16.msra.mxu1 %v606_v17  ;;  %v421_v15 = vld [vmem:[%s806_s5 + $0x18] sm:$0xff]  ;;  %s626_s5 = scalar_lea.vmem %s514_s15, 32 }
 0x459   :  { %608 = vmatprep.subr.bf16.mxu1 %v653_v18  ;;  %v609_v20 = vpack.c.bf16 %v421_v15, %v420_v19  ;;  %p627_p0 = scmp.ne.s32.totalorder %s514_s15, %s626_s5  ;;  %p632_p2 = scmp.lt.s32.totalorder %s626_s5, %s626_s5 }
 0x45b   :  { %p633_p3 = por %p632_p2, %p631_p1 }
 0x45c   :  { %610 = vmatpush3.bf16.msra.mxu1 %v609_v20 }
 0x45d   :  { %p634_p4 = pnand %p633_p3, %p627_p0 }
 0x526   :  { %v334_v21 = vpop.f32.mrb[0].mxu1 }
 0x527   :  { %v572_v22 = vpop.f32.mrb[1].mxu1 }
 0x52a   :  { %v414_v23 = vpop.f32.mrb[2].mxu1 }
 0x52b   :  { %v431_v24 = vrot.slane %v414_v23, 7  ;;  %v577_v25 = vpop.f32.mrb[3].mxu1 }
 0x52d   :  { %v432_v26 = vsel %vm197_vm2, %v431_v24, %v334_v21 }
 0x52e   :  { %587 = vmatmul.mubr.msk.f32.vlgmr.msra.gmra.mrb[4].mxu1 %vm140_vm1, %v432_v26 }
 0x601   :  { %v501_v28 = vpop.f32.mrb[4].mxu1 }
 0x602   :  { %v502_v29 = vadd.f32 %v528_v27, %v501_v28  ;;  %v588_v30 = vpop.f32.mrb[5].mxu1 }
 0x604   :  { %506 = vst.msk [vmem:[#allocation3] sm:$0x3] %vm505_vm6, %v502_v29 }
 0x605   :  { %637 = shalt.err (!%p634_p4)
}
 0x606   :  { %s638_s18 = scalar_lea.hbm %s809_s8, 32 }
 0x607   :  { %p639_p5 = scmp.ne.s32.totalorder %s809_s8, %s638_s18  ;;  %p642_p6 = scmp.lt.u32.totalorder %s638_s18, %s809_s8 }
 0x609   :  { %p644_p7 = pnand %p642_p6, %p639_p5 }
 0x60b   :  { %647 = shalt.err (!%p644_p7)
}
 0x60c   :  { %516 = dma.vmem_to_hbm [thread:$0]  %s514_s15, 32, %s809_s8, [#allocation4]  }
 0x60d   :  { %648 = dma.done.wait [#allocation4], 32  }
 0x60e   :  { %649 = vsyncadd [#allocation4], 4294967264 }
 0x60f   :  { %520 = vsyncpa [#allocation4], 1 }

</bundles_post_ra>
